<compile_context>
chip_gen: v7x
topology: tpu7x:2x2x1
jax: 0.10.0
libtpu: 0.0.40
codegen_flags: <defaults>
</compile_context>

<pallas_src>
import jax
import jax.numpy as jnp
from jax import lax
from jax.experimental import pallas as pl
from jax.experimental.pallas import tpu as pltpu


def _fused_dwsep_kernel(taps_ref, w_ref, out_ref):
    # taps_ref: (kk*c_in, TILE_L)  im2col'd dilated taps, row = t*c_in + c (VMEM)
    # w_ref   : (c_out, kk*c_in)   combined (pointwise * depthwise) weight  (VMEM)
    # out_ref : (c_out, TILE_L)
    out_ref[...] = jnp.dot(w_ref[...], taps_ref[...],
                           preferred_element_type=jnp.float32)


def _round_up(v, m):
    return ((v + m - 1) // m) * m


def conv2d_depthwise_separable(x, dw_w, pw_w, *, padding=0, dilation=1,
                               vmem_tile_budget_bytes=8 << 20):
    """x: (N, C_in, H, W); dw_w: (C_in, 1, K, K); pw_w: (C_out, C_in, 1, 1)."""
    n, c_in, h, w = x.shape
    c_out = pw_w.shape[0]
    k = dw_w.shape[-1]
    kk = k * k

    hp, wp = h + 2 * padding, w + 2 * padding
    h_out = hp - dilation * (k - 1)
    w_out = wp - dilation * (k - 1)
    L = n * h_out * w_out                       # batch + spatial folded (lane axis)
    L_lane = _round_up(L, 128)                  # lane-dense guard (unmasked vst)

    # ---- L-axis tiling: biggest 128-multiple tile whose double-buffered
    # taps + out slabs fit the VMEM budget.  Single grid step at toy sizes;
    # multiple "parallel" steps (megacore-shardable) at production L. ----
    taps_rows_padded = _round_up(kk * c_in, 8)
    out_rows_padded = _round_up(c_out, 8)
    bytes_per_lane = 2 * 4 * (taps_rows_padded + out_rows_padded)   # 2x-buffered f32
    tile_l = max(128, (vmem_tile_budget_bytes // bytes_per_lane) // 128 * 128)
    tile_l = min(tile_l, L_lane)
    num_tiles = pl.cdiv(L_lane, tile_l)
    L_total = num_tiles * tile_l

    # ---- Wrapper-side glue (XLA): pad + im2col the dilated taps. ----
    x_pad = jnp.pad(
        x, ((0, 0), (0, 0), (padding, padding), (padding, padding)))
    taps = [
        x_pad[:, :,
              kh * dilation: kh * dilation + h_out,
              kw * dilation: kw * dilation + w_out]
        for kh in range(k) for kw in range(k)
    ]
    taps = jnp.stack(taps, axis=0)                              # (kk, n, c_in, ho, wo)
    taps = taps.transpose(0, 2, 1, 3, 4).reshape(kk * c_in, L)  # row = t*c_in + c
    taps = taps.astype(jnp.float32)
    if L_total != L:
        taps = jnp.pad(taps, ((0, 0), (0, L_total - L)))

    # ---- Combined weight: W[o, t*c_in + c] = pw[o, c] * dw[c, t]. ----
    dw_flat = dw_w.reshape(c_in, kk).astype(jnp.float32)        # (c_in, kk)
    pw = pw_w.reshape(c_out, c_in).astype(jnp.float32)          # (c_out, c_in)
    w_comb = (pw[:, None, :] * dw_flat.T[None, :, :]).reshape(c_out, kk * c_in)

    cost = pl.CostEstimate(
        flops=2 * c_out * kk * c_in * L_total,
        transcendentals=0,
        bytes_accessed=(taps.size + w_comb.size + c_out * L_total) * 4,
    )

    out_flat = pl.pallas_call(
        _fused_dwsep_kernel,
        out_shape=jax.ShapeDtypeStruct((c_out, L_total), jnp.float32),
        grid=(num_tiles,),
        in_specs=[
            pl.BlockSpec((kk * c_in, tile_l), lambda i: (0, i)),
            pl.BlockSpec((c_out, kk * c_in), lambda i: (0, 0)),   # resident weight
        ],
        out_specs=pl.BlockSpec((c_out, tile_l), lambda i: (0, i)),
        compiler_params=pltpu.CompilerParams(
            dimension_semantics=("parallel",)),
        cost_estimate=cost,
    )(taps, w_comb)

    # (c_out, n*h_out*w_out) -> (n, c_out, h_out, w_out)  (PyTorch NCHW parity).
    out = out_flat[:, :L]
    return out.reshape(c_out, n, h_out, w_out).transpose(1, 0, 2, 3)


def _reference(x, dw_w, pw_w, *, padding, dilation):
    """Pure-JAX reference (mirrors PyTorch's NCHW / OIHW conv semantics)."""
    c_in = x.shape[1]
    dn = lax.conv_dimension_numbers(x.shape, dw_w.shape, ("NCHW", "OIHW", "NCHW"))
    y = lax.conv_general_dilated(
        x, dw_w,
        window_strides=(1, 1),
        padding=[(padding, padding), (padding, padding)],
        rhs_dilation=(dilation, dilation),
        dimension_numbers=dn,
        feature_group_count=c_in,
    )
    dn2 = lax.conv_dimension_numbers(y.shape, pw_w.shape, ("NCHW", "OIHW", "NCHW"))
    return lax.conv_general_dilated(
        y, pw_w,
        window_strides=(1, 1),
        padding=[(0, 0), (0, 0)],
        dimension_numbers=dn2,
    )


if __name__ == "__main__":
    # Module config: inC=4, outC=8, ksize=3, padding=2, dilation=2 (same-size output).
    N, C_IN, C_OUT, H, W = 2, 4, 8, 16, 16
    KSIZE, PADDING, DILATION = 3, 2, 2

    key = jax.random.PRNGKey(0)
    kx, kdw, kpw = jax.random.split(key, 3)

    x = jax.random.normal(kx, (N, C_IN, H, W), jnp.float32)
    # Depthwise weight (groups=C_IN): shape (C_IN, 1, K, K), no bias.
    dw_w = jax.random.normal(kdw, (C_IN, 1, KSIZE, KSIZE), jnp.float32) * 0.1
    # Pointwise 1x1 weight: shape (C_OUT, C_IN, 1, 1), no bias.
    pw_w = jax.random.normal(kpw, (C_OUT, C_IN, 1, 1), jnp.float32) * 0.1

    out = conv2d_depthwise_separable(
        x, dw_w, pw_w, padding=PADDING, dilation=DILATION
    )
    out = jax.block_until_ready(out)

    ref = _reference(x, dw_w, pw_w, padding=PADDING, dilation=DILATION)
    assert out.shape == ref.shape, (out.shape, ref.shape)
    assert jnp.allclose(out, ref, atol=1e-4, rtol=1e-4), "mismatch vs reference"

    print("KERNEL_OK")
</pallas_src>

<mosaic_0001>
module attributes {stable_mosaic.version = 11 : i64} {
  func.func @_fused_dwsep_kernel(%arg0: i32, %arg1: memref<36x512xf32, #tpu.memory_space<vmem>>, %arg2: memref<8x36xf32, #tpu.memory_space<vmem>>, %arg3: memref<8x512xf32, #tpu.memory_space<vmem>>) attributes {dimension_semantics = [#tpu.dimension_semantics<parallel>], iteration_bounds = array<i64: 1>, scalar_prefetch = 0 : i64, scratch_operands = 0 : i64, tpu.core_type = #tpu.core_type<tc>, window_params = [{transform_indices = @transform_0, window_bounds = array<i64: 36, 512>}, {pipeline_mode = #tpu.pipeline_mode<synchronous>, transform_indices = @transform_1, window_bounds = array<i64: 8, 36>}, {transform_indices = @transform_2, window_bounds = array<i64: 8, 512>}]} {
    %c0 = arith.constant 0 : index
    %c0_0 = arith.constant 0 : index
    %0 = vector.load %arg2[%c0, %c0_0] : memref<8x36xf32, #tpu.memory_space<vmem>>, vector<8x36xf32>
    %c0_1 = arith.constant 0 : index
    %c0_2 = arith.constant 0 : index
    %1 = vector.load %arg1[%c0_1, %c0_2] : memref<36x512xf32, #tpu.memory_space<vmem>>, vector<36x512xf32>
    %cst = arith.constant dense<0.000000e+00> : vector<8x512xf32>
    %2 = tpu.matmul %0, %1, %cst {dimension_numbers = #tpu.dot_dimension_numbers<[1], [0], [0], [1], [0, 0, 1, 1], [], []>} : vector<8x36xf32>, vector<36x512xf32>, vector<8x512xf32> -> vector<8x512xf32>
    %c0_3 = arith.constant 0 : index
    %c0_4 = arith.constant 0 : index
    %3 = vector.load %arg3[%c0_3, %c0_4] : memref<8x512xf32, #tpu.memory_space<vmem>>, vector<8x512xf32>
    tpu.vector_store %arg3[%c0_3, %c0_4], %2 {strides = array<i32>} : memref<8x512xf32, #tpu.memory_space<vmem>>, vector<8x512xf32>,
    return
  }
  func.func @transform_0(%arg0: i32) -> (i32, i32) {
    %c0_i32 = arith.constant 0 : i32
    %c0_i32_0 = arith.constant 0 : i32
    return %c0_i32, %arg0 : i32, i32
  }
  func.func @transform_1(%arg0: i32) -> (i32, i32) {
    %c0_i32 = arith.constant 0 : i32
    %c0_i32_0 = arith.constant 0 : i32
    %c0_i32_1 = arith.constant 0 : i32
    return %c0_i32, %c0_i32_0 : i32, i32
  }
  func.func @transform_2(%arg0: i32) -> (i32, i32) {
    %c0_i32 = arith.constant 0 : i32
    %c0_i32_0 = arith.constant 0 : i32
    return %c0_i32, %arg0 : i32, i32
  }
}

</mosaic_0001>

<bundles_post_ra>
// kernel: tpu_custom_call.1
= control target key start
LH: loop header
LB: loop body
LE: loop exit
PB: predicated region body
PF: predicated region fallthrough
CT: control target
= control target key end

     0   :  { %7 = vsyncpa [#allocation3], 0  ;;  %s395_s0 = inlined_call_operand.hbm [shape: f32[36,512], index: 0, kind: input, shape index: {}]   ;;  %s396_s1 = inlined_call_operand.hbm [shape: f32[8,36], index: 1, kind: input, shape index: {}]   ;;  %s397_s2 = inlined_call_operand.hbm [shape: f32[8,512], index: 2, kind: output, shape index: {}]  }
   0x1   :  { %8 = vsyncpa [#allocation6], 0 }
   0x2   :  { %9 = vsyncpa [#allocation4], 0  ;;  %s338_s9 = smov [#allocation2]   ;;  %s266_s13 = scalar_lea.hbm %s395_s0, 2560 }
   0x3   :  { %s15_s10 = sshll.u32 %s338_s9, 4  ;;  %p267_p0 = scmp.ne.s32.totalorder %s395_s0, %s266_s13  ;;  %s16_s10 = int_to_ptr.vmem [resolvable:$true] %s15_s10 }
   0x4   :  { %p270_p1 = scmp.lt.u32.totalorder %s266_s13, %s395_s0 }
   0x6   :  { %p272_p2 = pnand %p270_p1, %p267_p0 }
   0x8   :  { %275 = shalt.err (!%p272_p2)
}
   0x9   :  { %s276_s18 = scalar_lea.vmem %s16_s10, 2560  ;;  %p281_p4 = scmp.lt.s32.totalorder %s16_s10, %s16_s10 }
   0xa   :  { %p277_p3 = scmp.ne.s32.totalorder %s16_s10, %s276_s18  ;;  %p282_p5 = scmp.lt.s32.totalorder %s276_s18, %s276_s18 }
   0xc   :  { %p283_p6 = por %p282_p5, %p281_p4 }
   0xe   :  { %p284_p7 = pnand %p283_p6, %p277_p3 }
  0x10   :  { %287 = shalt.err (!%p284_p7)
}
  0x11   :  { %s339_s19 = smov 512   ;;  %s340_s20 = smov 32  }
  0x12   :  { %21 = dma.hbm_to_vmem [thread:$0]  %s395_s0, 2560, %s16_s10, [#allocation3], %s339_s19, %s339_s19, %s340_s20  }
  0x13   :  { %s341_s23 = smov [#allocation5]   ;;  %s288_s27 = scalar_lea.hbm %s396_s1, 128 }
  0x14   :  { %s28_s24 = sshll.u32 %s341_s23, 4  ;;  %p289_p8 = scmp.ne.s32.totalorder %s396_s1, %s288_s27  ;;  %s29_s24 = int_to_ptr.vmem [resolvable:$true] %s28_s24 }
  0x15   :  { %p292_p9 = scmp.lt.u32.totalorder %s288_s27, %s396_s1 }
  0x17   :  { %p294_p10 = pnand %p292_p9, %p289_p8 }
  0x19   :  { %297 = shalt.err (!%p294_p10)
}
  0x1a   :  { %s298_s4 = scalar_lea.vmem %s29_s24, 128  ;;  %p303_p12 = scmp.lt.s32.totalorder %s29_s24, %s29_s24 }
  0x1b   :  { %p299_p11 = scmp.ne.s32.totalorder %s29_s24, %s298_s4  ;;  %p304_p13 = scmp.lt.s32.totalorder %s298_s4, %s298_s4 }
  0x1d   :  { %p305_p0 = por %p304_p13, %p303_p12 }
  0x1f   :  { %p306_p1 = pnand %p305_p0, %p299_p11 }
  0x21   :  { %309 = shalt.err (!%p306_p1)
}
  0x22   :  { %31 = dma.hbm_to_vmem [thread:$0]  %s396_s1, 128, %s29_s24, [#allocation6]  }
  0x23   :  { %332 = dma.done.wait [#allocation3], 2560  }
  0x24   :  { %333 = vsyncadd [#allocation3], 4294964736 }
  0x25   :  { %334 = dma.done.wait [#allocation6], 128  }
  0x26   :  { %335 = vsyncadd [#allocation6], 4294967168  ;;  %v342_v0 = vmov 0.0   ;;  %v40_v1 = vld [vmem:[#allocation2 + $0x8] sm:$0xff]  ;;  %v42_v3 = vld [vmem:[#allocation2 + $0x18] sm:$0xff]  ;;  %vm63_vm0 = vcmask 1043456  }
  0x27   :  { %140 = vmatprep.mubr.f32.mxu0 %v342_v0  ;;  %211 = vmatprep.mubr.f32.mxu1 %v342_v0  ;;  %v44_v2 = vld [vmem:[#allocation2 + $0x28] sm:$0xff]  ;;  %v46_v5 = vld [vmem:[#allocation2 + $0x38] sm:$0xff]  ;;  %v39_v6 = vld [vmem:[#allocation2] sm:$0xff]  ;;  %vm59_vm1 = vcmask 293888   ;;  %s343_s1 = smov [#allocation7]  }
  0x28   :  { %v244_v4 = vpack.c.bf16 %v44_v2, %v40_v1  ;;  %v43_v7 = vld [vmem:[#allocation2 + $0x20] sm:$0xff]  ;;  %v252_v8 = vpack.c.bf16 %v46_v5, %v42_v3  ;;  %v41_v10 = vld [vmem:[#allocation2 + $0x10] sm:$0xff]  ;;  %v48_v12 = vld [vmem:[#allocation2 + $0x48] sm:$0xff]  ;;  %s228_s6 = sshll.u32 %s343_s1, 4  ;;  %s229_s6 = int_to_ptr.vmem [resolvable:$true] %s228_s6 }
  0x29   :  { %v246_v9 = vpack.c.bf16 %v43_v7, %v39_v6  ;;  %v45_v11 = vld [vmem:[#allocation2 + $0x30] sm:$0xff]  ;;  %v52_v14 = vld [vmem:[#allocation2 + $0x68] sm:$0xff]  ;;  %v50_v15 = vld [vmem:[#allocation2 + $0x58] sm:$0xff]  ;;  %s310_s7 = scalar_lea.vmem %s229_s6, 512  ;;  %p315_p3 = scmp.lt.s32.totalorder %s229_s6, %s229_s6 }
  0x2a   :  { %245 = vmatprep.subr.bf16.mxu0 %v244_v4  ;;  %v254_v13 = vpack.c.bf16 %v45_v11, %v41_v10  ;;  %v54_v16 = vld [vmem:[#allocation2 + $0x78] sm:$0xff]  ;;  %253 = vmatprep.subr.bf16.mxu1 %v252_v8  ;;  %v248_v17 = vpack.c.bf16 %v52_v14, %v48_v12  ;;  %v47_v19 = vld [vmem:[#allocation2 + $0x40] sm:$0xff]  ;;  %v49_v21 = vld [vmem:[#allocation2 + $0x50] sm:$0xff]  ;;  %p311_p2 = scmp.ne.s32.totalorder %s229_s6, %s310_s7  ;;  %p316_p4 = scmp.lt.s32.totalorder %s310_s7, %s310_s7 }
  0x2b   :  { %247 = vmatpush1.bf16.msra.mxu0 %v246_v9  ;;  %v256_v18 = vpack.c.bf16 %v54_v16, %v50_v15  ;;  %v51_v20 = vld [vmem:[#allocation2 + $0x60] sm:$0xff]  ;;  %v53_v23 = vld [vmem:[#allocation2 + $0x70] sm:$0xff]  ;;  %v56_v25 = vld [vmem:[#allocation2 + $0x88] sm:$0xf] }
  0x2c   :  { %255 = vmatpush1.bf16.msra.mxu1 %v254_v13  ;;  %v250_v22 = vpack.c.bf16 %v51_v20, %v47_v19  ;;  %249 = vmatprep.subr.bf16.mxu0 %v248_v17  ;;  %v258_v24 = vpack.c.bf16 %v53_v23, %v49_v21  ;;  %v58_v26 = vld [vmem:[#allocation2 + $0x98] sm:$0xf]  ;;  %v55_v27 = vld [vmem:[#allocation2 + $0x80] sm:$0xf]  ;;  %v57_v28 = vld [vmem:[#allocation2 + $0x90] sm:$0xf]  ;;  %p317_p5 = por %p316_p4, %p315_p3 }
  0x2d   :  { %257 = vmatprep.subr.bf16.mxu1 %v256_v18  ;;  %v38_v29 = vld [vmem:[#allocation5] sm:$0xff] }
  0x2e   :  { %p318_p6 = pnand %p317_p5, %p311_p2 }
  0x2f   :  { %251 = vmatpush1.bf16.msra.mxu0 %v250_v22 }
  0x30   :  { %259 = vmatpush1.bf16.msra.mxu1 %v258_v24  ;;  %238 = vmatprep.subr.msk.mxu0 %vm63_vm0, %v56_v25 }
  0x31   :  { %241 = vmatprep.subr.msk.mxu1 %vm63_vm0, %v58_v26 }
  0x33   :  { %239 = vmatpush1.msk.msra.mxu0 %vm63_vm0, %v55_v27 }
  0x34   :  { %242 = vmatpush1.msk.msra.mxu1 %vm63_vm0, %v57_v28  ;;  %240 = vmatmul.mubr.msk.f32.vlgmr.msra.gmra.mrb[0].mxu0 %vm59_vm1, %v38_v29 }
  0x35   :  { %243 = vmatmul.mubr.msk.f32.vlgmr.msra.gmra.mrb[0].mxu1 %vm59_vm1, %v38_v29 }
 0x107   :  { %v142_v30 = vpop.f32.mrb[0].mxu0 }
 0x108   :  { %218 = vst [vmem:[#allocation7] sm:$0xff] %v142_v30  ;;  %v213_v31 = vpop.f32.mrb[0].mxu1  ;;  %v144_v32 = vpop.f32.mrb[1].mxu0 }
 0x109   :  { %220 = vst [vmem:[#allocation7 + $0x10] sm:$0xff] %v213_v31  ;;  %219 = vst [vmem:[#allocation7 + $0x8] sm:$0xff] %v144_v32  ;;  %v215_v33 = vpop.f32.mrb[1].mxu1 }
 0x10a   :  { %221 = vst [vmem:[#allocation7 + $0x18] sm:$0xff] %v215_v33 }
 0x10b   :  { %321 = shalt.err (!%p318_p6)
}
 0x10c   :  { %s322_s10 = scalar_lea.hbm %s397_s2, 512 }
 0x10d   :  { %p323_p7 = scmp.ne.s32.totalorder %s397_s2, %s322_s10  ;;  %p326_p8 = scmp.lt.u32.totalorder %s322_s10, %s397_s2 }
 0x10f   :  { %p328_p9 = pnand %p326_p8, %p323_p7 }
 0x111   :  { %331 = shalt.err (!%p328_p9)
}
 0x112   :  { %231 = dma.vmem_to_hbm [thread:$0]  %s229_s6, 512, %s397_s2, [#allocation4]  }
 0x113   :  { %336 = dma.done.wait [#allocation4], 512  }
 0x114   :  { %337 = vsyncadd [#allocation4], 4294966784 }
 0x115   :  { %235 = vsyncpa [#allocation3], 1 }
 0x116   :  { %236 = vsyncpa [#allocation6], 1 }
 0x117   :  { %237 = vsyncpa [#allocation4], 1 }

</bundles_post_ra>
